<compile_context>
chip_gen: v7x
topology: tpu7x:2x2x1
jax: 0.10.0
libtpu: 0.0.40
codegen_flags: <defaults>
</compile_context>

<pallas_src>
import jax
import jax.numpy as jnp
from jax.experimental import pallas as pl
from jax.experimental.pallas import tpu as pltpu


def _round_up(n, m):
    return (n + m - 1) // m * m


# ---------------------------------------------------------------------------
# Kernel: fused  relu(x@w1 + b1) @ w23 + b23 -> relu -> @ w4 + b4
# ---------------------------------------------------------------------------
def _ae_kernel(x_ref, w1_ref, b1_ref, w23_ref, b23_ref, w4_ref, b4_ref, out_ref):
    cdt = w1_ref.dtype  # MXU-input compute dtype (bf16 by default, or f32)

    # Cast the activation tile in-kernel (VPU) instead of a wrapper HBM pass.
    x = x_ref[...].astype(cdt)

    # encoder Linear(input_dim -> 256) + ReLU   (f32 accumulation, f32 bias)
    h1 = jnp.dot(x, w1_ref[...], preferred_element_type=jnp.float32)
    h1 = jnp.maximum(h1 + b1_ref[...], 0.0)

    # fused (256 -> latent -> 256) == one dense 256x256 matmul, + ReLU
    h2 = jnp.dot(h1.astype(cdt), w23_ref[...], preferred_element_type=jnp.float32)
    h2 = jnp.maximum(h2 + b23_ref[...], 0.0)

    # decoder Linear(256 -> input_dim)
    out = jnp.dot(h2.astype(cdt), w4_ref[...], preferred_element_type=jnp.float32)
    out_ref[...] = (out + b4_ref[...]).astype(out_ref.dtype)


def _resident_spec(arr):
    # Grid-invariant full-array block: stays resident in VMEM across all steps.
    return pl.BlockSpec(arr.shape, lambda i: (0, 0))


# ---------------------------------------------------------------------------
# Parameter preparation (done once, outside the kernel)
# ---------------------------------------------------------------------------
def prepare_params(params, *, compute_dtype=jnp.bfloat16):
    """Fuse the latent matmuls exactly and cast weights to the compute dtype.

    z = h1@w2 + b2;  h2_pre = z@w3 + b3 = h1@(w2@w3) + (b2@w3 + b3)
    (exact in real arithmetic; bf16 quantizes the fused product.)
    """
    w1, b1 = params["w1"], params["b1"]
    w2, b2 = params["w2"], params["b2"]
    w3, b3 = params["w3"], params["b3"]
    w4, b4 = params["w4"], params["b4"]

    w23 = jnp.dot(w2.astype(jnp.float32), w3.astype(jnp.float32))
    b23 = jnp.dot(b2.astype(jnp.float32), w3.astype(jnp.float32)) + b3.astype(jnp.float32)

    return dict(
        w1=w1.astype(compute_dtype), b1=b1.astype(jnp.float32),
        w23=w23.astype(compute_dtype), b23=b23.astype(jnp.float32),
        w4=w4.astype(compute_dtype), b4=b4.astype(jnp.float32),
    )


# ---------------------------------------------------------------------------
# Forward pass
# ---------------------------------------------------------------------------
def patch_autoencoder_forward(x, prepped, *, batch_tile=None, out_dtype=jnp.float32):
    """x: (B, input_dim) -> (B, input_dim).  No wrapper-side HBM copies."""
    B, D = x.shape
    w1, b1 = prepped["w1"], prepped["b1"]
    w23, b23 = prepped["w23"], prepped["b23"]
    w4, b4 = prepped["w4"], prepped["b4"]
    hidden = w1.shape[1]
    assert w1.shape[0] == D, "input_dim mismatch between x and prepared params"

    # Batch tile: big tiles amortize per-grid-step overhead (~0.35 us) and
    # keep DMAs large; keep >=4 grid steps when possible so v7x's two
    # TensorCores both get work on the "parallel" axis.  Must be a multiple
    # of 8 sublanes.  Ragged remainders are handled by Pallas's partial
    # last block (masked stores) - no wrapper padding.
    if batch_tile is None:
        tb = 2048
        while tb > 256 and pl.cdiv(B, tb) < 4:
            tb //= 2
        tb = min(tb, _round_up(max(B, 1), 8))
    else:
        tb = _round_up(max(batch_tile, 8), 8)
    grid = (pl.cdiv(B, tb),)

    x_isz = x.dtype.itemsize
    o_isz = jnp.dtype(out_dtype).itemsize
    param_bytes = sum(int(a.size) * a.dtype.itemsize for a in (w1, b1, w23, b23, w4, b4))

    # Advisory cost estimate for XLA's scheduler.
    flops = 2 * B * (D * hidden + hidden * hidden + hidden * D)
    bytes_accessed = B * D * (x_isz + o_isz) + param_bytes

    # Scoped-VMEM budget: double-buffered x/out tiles + resident params +
    # f32 intermediates, 2x headroom; capped at 48 MiB (< v7x's 64 MiB).
    vmem_est = (2 * tb * D * x_isz            # x tile (double-buffered)
                + 2 * tb * D * o_isz          # out tile (double-buffered)
                + 2 * param_bytes             # resident weights/biases
                + 4 * tb * hidden * 4)        # f32 intermediates headroom
    vmem_limit = int(min(48 * 2**20, max(4 * 2**20, 2 * vmem_est)))

    return pl.pallas_call(
        _ae_kernel,
        out_shape=jax.ShapeDtypeStruct((B, D), out_dtype),
        grid_spec=pltpu.PrefetchScalarGridSpec(
            num_scalar_prefetch=0,
            grid=grid,
            in_specs=[
                pl.BlockSpec((tb, D), lambda i: (i, 0)),   # x, batch-tiled
                _resident_spec(w1), _resident_spec(b1),
                _resident_spec(w23), _resident_spec(b23),
                _resident_spec(w4), _resident_spec(b4),
            ],
            out_specs=pl.BlockSpec((tb, D), lambda i: (i, 0)),
        ),
        compiler_params=pltpu.CompilerParams(
            dimension_semantics=("parallel",),
            vmem_limit_bytes=vmem_limit),
        cost_estimate=pl.CostEstimate(
            flops=int(flops), transcendentals=0, bytes_accessed=int(bytes_accessed)),
    )(x, w1, b1, w23, b23, w4, b4)


# ---------------------------------------------------------------------------
# Init + pure-JAX reference (unfused, matches the PyTorch module)
# ---------------------------------------------------------------------------
def init_params(key, input_dim, latent_dim, hidden=256):
    ks = jax.random.split(key, 8)

    def lin(kw, kb, fan_in, fan_out):
        bound = 1.0 / jnp.sqrt(fan_in)
        w = jax.random.uniform(kw, (fan_in, fan_out), jnp.float32, -bound, bound)
        b = jax.random.uniform(kb, (1, fan_out), jnp.float32, -bound, bound)
        return w, b

    w1, b1 = lin(ks[0], ks[1], input_dim, hidden)
    w2, b2 = lin(ks[2], ks[3], hidden, latent_dim)
    w3, b3 = lin(ks[4], ks[5], latent_dim, hidden)
    w4, b4 = lin(ks[6], ks[7], hidden, input_dim)
    return dict(w1=w1, b1=b1, w2=w2, b2=b2, w3=w3, b3=b3, w4=w4, b4=b4)


def _reference_forward(x, p):
    h1 = jnp.maximum(x @ p["w1"] + p["b1"], 0.0)
    z = h1 @ p["w2"] + p["b2"]
    h2 = jnp.maximum(z @ p["w3"] + p["b3"], 0.0)
    return h2 @ p["w4"] + p["b4"]


if __name__ == "__main__":
    key = jax.random.PRNGKey(0)
    k_x, k_p = jax.random.split(key)

    # Small deterministic example: a batch of 64 flattened 8x8 patches
    # (input_dim = 64 features per patch), latent_dim = 32.
    B, input_dim, latent_dim = 64, 64, 32
    x = jax.random.normal(k_x, (B, input_dim), jnp.float32)
    params = init_params(k_p, input_dim, latent_dim)
    ref = _reference_forward(x, params)

    # f32 path: bit-faithful check of the fused kernel against the reference.
    p_f32 = prepare_params(params, compute_dtype=jnp.float32)
    out_f32 = jax.block_until_ready(patch_autoencoder_forward(x, p_f32))
    assert out_f32.shape == (B, input_dim)
    assert jnp.allclose(out_f32, ref, atol=1e-3, rtol=1e-3), "f32 mismatch vs reference"

    # Default bf16 compute path (f32 accumulation/biases): halves weight DMA
    # and gives 2-3x MXU throughput; looser tolerance (fused w2@w3 is
    # quantized after fusion).
    p_bf16 = prepare_params(params)  # compute_dtype=jnp.bfloat16 default
    out_bf16 = jax.block_until_ready(patch_autoencoder_forward(x, p_bf16))
    assert out_bf16.shape == (B, input_dim)
    assert jnp.allclose(out_bf16, ref, atol=5e-2, rtol=5e-2), "bf16 mismatch vs reference"

    # Ragged batch (not a multiple of 8 / the tile) exercises the masked
    # partial last block without any wrapper-side padding or slicing.
    out_rag = jax.block_until_ready(patch_autoencoder_forward(x[:37], p_f32))
    assert out_rag.shape == (37, input_dim)
    assert jnp.allclose(out_rag, ref[:37], atol=1e-3, rtol=1e-3), "ragged mismatch"

    print("KERNEL_OK")
</pallas_src>

<mosaic_0001>
module attributes {stable_mosaic.version = 11 : i64} {
  func.func @_ae_kernel(%arg0: i32, %arg1: memref<64x64xf32, #tpu.memory_space<vmem>>, %arg2: memref<64x256xf32, #tpu.memory_space<vmem>>, %arg3: memref<1x256xf32, #tpu.memory_space<vmem>>, %arg4: memref<256x256xf32, #tpu.memory_space<vmem>>, %arg5: memref<1x256xf32, #tpu.memory_space<vmem>>, %arg6: memref<256x64xf32, #tpu.memory_space<vmem>>, %arg7: memref<1x64xf32, #tpu.memory_space<vmem>>, %arg8: memref<64x64xf32, #tpu.memory_space<vmem>>) attributes {dimension_semantics = [#tpu.dimension_semantics<parallel>], iteration_bounds = array<i64: 1>, scalar_prefetch = 0 : i64, scratch_operands = 0 : i64, tpu.core_type = #tpu.core_type<tc>, window_params = [{transform_indices = @transform_0, window_bounds = array<i64: 64, 64>}, {pipeline_mode = #tpu.pipeline_mode<synchronous>, transform_indices = @transform_1, window_bounds = array<i64: 64, 256>}, {pipeline_mode = #tpu.pipeline_mode<synchronous>, transform_indices = @transform_2, window_bounds = array<i64: 1, 256>}, {pipeline_mode = #tpu.pipeline_mode<synchronous>, transform_indices = @transform_3, window_bounds = array<i64: 256, 256>}, {pipeline_mode = #tpu.pipeline_mode<synchronous>, transform_indices = @transform_4, window_bounds = array<i64: 1, 256>}, {pipeline_mode = #tpu.pipeline_mode<synchronous>, transform_indices = @transform_5, window_bounds = array<i64: 256, 64>}, {pipeline_mode = #tpu.pipeline_mode<synchronous>, transform_indices = @transform_6, window_bounds = array<i64: 1, 64>}, {transform_indices = @transform_7, window_bounds = array<i64: 64, 64>}]} {
    %c0 = arith.constant 0 : index
    %c0_0 = arith.constant 0 : index
    %0 = vector.load %arg1[%c0, %c0_0] : memref<64x64xf32, #tpu.memory_space<vmem>>, vector<64x64xf32>
    %c0_1 = arith.constant 0 : index
    %c0_2 = arith.constant 0 : index
    %1 = vector.load %arg2[%c0_1, %c0_2] : memref<64x256xf32, #tpu.memory_space<vmem>>, vector<64x256xf32>
    %cst = arith.constant dense<0.000000e+00> : vector<64x256xf32>
    %2 = tpu.matmul %0, %1, %cst {dimension_numbers = #tpu.dot_dimension_numbers<[1], [0], [0], [1], [0, 0, 1, 1], [], []>} : vector<64x64xf32>, vector<64x256xf32>, vector<64x256xf32> -> vector<64x256xf32>
    %c0_3 = arith.constant 0 : index
    %c0_4 = arith.constant 0 : index
    %3 = vector.load %arg3[%c0_3, %c0_4] : memref<1x256xf32, #tpu.memory_space<vmem>>, vector<1x256xf32>
    %4 = vector.broadcast %3 : vector<1x256xf32> to vector<64x256xf32>
    %5 = arith.addf %2, %4 : vector<64x256xf32>
    %cst_5 = arith.constant 0.000000e+00 : f32
    %6 = vector.broadcast %cst_5 : f32 to vector<64x256xf32>
    %7 = arith.maximumf %5, %6 : vector<64x256xf32>
    %c0_6 = arith.constant 0 : index
    %c0_7 = arith.constant 0 : index
    %8 = vector.load %arg4[%c0_6, %c0_7] : memref<256x256xf32, #tpu.memory_space<vmem>>, vector<256x256xf32>
    %cst_8 = arith.constant dense<0.000000e+00> : vector<64x256xf32>
    %9 = tpu.matmul %7, %8, %cst_8 {dimension_numbers = #tpu.dot_dimension_numbers<[1], [0], [0], [1], [0, 0, 1, 1], [], []>} : vector<64x256xf32>, vector<256x256xf32>, vector<64x256xf32> -> vector<64x256xf32>
    %c0_9 = arith.constant 0 : index
    %c0_10 = arith.constant 0 : index
    %10 = vector.load %arg5[%c0_9, %c0_10] : memref<1x256xf32, #tpu.memory_space<vmem>>, vector<1x256xf32>
    %11 = vector.broadcast %10 : vector<1x256xf32> to vector<64x256xf32>
    %12 = arith.addf %9, %11 : vector<64x256xf32>
    %cst_11 = arith.constant 0.000000e+00 : f32
    %13 = vector.broadcast %cst_11 : f32 to vector<64x256xf32>
    %14 = arith.maximumf %12, %13 : vector<64x256xf32>
    %c0_12 = arith.constant 0 : index
    %c0_13 = arith.constant 0 : index
    %15 = vector.load %arg6[%c0_12, %c0_13] : memref<256x64xf32, #tpu.memory_space<vmem>>, vector<256x64xf32>
    %cst_14 = arith.constant dense<0.000000e+00> : vector<64x64xf32>
    %16 = tpu.matmul %14, %15, %cst_14 {dimension_numbers = #tpu.dot_dimension_numbers<[1], [0], [0], [1], [0, 0, 1, 1], [], []>} : vector<64x256xf32>, vector<256x64xf32>, vector<64x64xf32> -> vector<64x64xf32>
    %c0_15 = arith.constant 0 : index
    %c0_16 = arith.constant 0 : index
    %17 = vector.load %arg7[%c0_15, %c0_16] : memref<1x64xf32, #tpu.memory_space<vmem>>, vector<1x64xf32>
    %18 = vector.broadcast %17 : vector<1x64xf32> to vector<64x64xf32>
    %19 = arith.addf %16, %18 : vector<64x64xf32>
    %c0_17 = arith.constant 0 : index
    %c0_18 = arith.constant 0 : index
    %20 = vector.load %arg8[%c0_17, %c0_18] : memref<64x64xf32, #tpu.memory_space<vmem>>, vector<64x64xf32>
    tpu.vector_store %arg8[%c0_17, %c0_18], %19 {strides = array<i32>} : memref<64x64xf32, #tpu.memory_space<vmem>>, vector<64x64xf32>,
    return
  }
  func.func @transform_0(%arg0: i32) -> (i32, i32) {
    %c0_i32 = arith.constant 0 : i32
    %c0_i32_0 = arith.constant 0 : i32
    return %arg0, %c0_i32 : i32, i32
  }
  func.func @transform_1(%arg0: i32) -> (i32, i32) {
    %c0_i32 = arith.constant 0 : i32
    %c0_i32_0 = arith.constant 0 : i32
    %c0_i32_1 = arith.constant 0 : i32
    return %c0_i32, %c0_i32_0 : i32, i32
  }
  func.func @transform_2(%arg0: i32) -> (i32, i32) {
    %c0_i32 = arith.constant 0 : i32
    %c0_i32_0 = arith.constant 0 : i32
    %c0_i32_1 = arith.constant 0 : i32
    return %c0_i32, %c0_i32_0 : i32, i32
  }
  func.func @transform_3(%arg0: i32) -> (i32, i32) {
    %c0_i32 = arith.constant 0 : i32
    %c0_i32_0 = arith.constant 0 : i32
    %c0_i32_1 = arith.constant 0 : i32
    return %c0_i32, %c0_i32_0 : i32, i32
  }
  func.func @transform_4(%arg0: i32) -> (i32, i32) {
    %c0_i32 = arith.constant 0 : i32
    %c0_i32_0 = arith.constant 0 : i32
    %c0_i32_1 = arith.constant 0 : i32
    return %c0_i32, %c0_i32_0 : i32, i32
  }
  func.func @transform_5(%arg0: i32) -> (i32, i32) {
    %c0_i32 = arith.constant 0 : i32
    %c0_i32_0 = arith.constant 0 : i32
    %c0_i32_1 = arith.constant 0 : i32
    return %c0_i32, %c0_i32_0 : i32, i32
  }
  func.func @transform_6(%arg0: i32) -> (i32, i32) {
    %c0_i32 = arith.constant 0 : i32
    %c0_i32_0 = arith.constant 0 : i32
    %c0_i32_1 = arith.constant 0 : i32
    return %c0_i32, %c0_i32_0 : i32, i32
  }
  func.func @transform_7(%arg0: i32) -> (i32, i32) {
    %c0_i32 = arith.constant 0 : i32
    %c0_i32_0 = arith.constant 0 : i32
    return %arg0, %c0_i32 : i32, i32
  }
}

</mosaic_0001>

<bundles_post_ra>
// kernel: tpu_custom_call.1
= control target key start
LH: loop header
LB: loop body
LE: loop exit
PB: predicated region body
PF: predicated region fallthrough
CT: control target
= control target key end

     0   :  { %12 = vsyncpa [#allocation3], 0  ;;  %s1121_s0 = inlined_call_operand.vmem [shape: f32[64,64], index: 0, kind: input, shape index: {}]   ;;  %s1122_s1 = inlined_call_operand.vmem [shape: f32[64,256], index: 1, kind: input, shape index: {}]   ;;  %s1123_s2 = inlined_call_operand.vmem [shape: f32[1,256], index: 2, kind: input, shape index: {}]   ;;  %s1124_s3 = inlined_call_operand.hbm [shape: f32[256,256], index: 3, kind: input, shape index: {}]   ;;  %s1125_s4 = inlined_call_operand.vmem [shape: f32[1,256], index: 4, kind: input, shape index: {}]   ;;  %s1126_s5 = inlined_call_operand.vmem [shape: f32[256,64], index: 5, kind: input, shape index: {}]   ;;  %s1127_s6 = inlined_call_operand.vmem [shape: f32[1,64], index: 6, kind: input, shape index: {}]   ;;  %s1128_s7 = inlined_call_operand.hbm [shape: f32[64,64], index: 7, kind: output, shape index: {}]  }
   0x1   :  { %13 = vsyncpa [#allocation4], 0  ;;  %s837_s24 = smov [#allocation2]   ;;  %s789_s28 = scalar_lea.hbm %s1124_s3, 8192 }
   0x2   :  { %s25_s25 = sshll.u32 %s837_s24, 4  ;;  %p790_p0 = scmp.ne.s32.totalorder %s1124_s3, %s789_s28  ;;  %s26_s25 = int_to_ptr.vmem [resolvable:$true] %s25_s25 }
   0x3   :  { %p793_p1 = scmp.lt.u32.totalorder %s789_s28, %s1124_s3 }
   0x5   :  { %p795_p2 = pnand %p793_p1, %p790_p0 }
   0x7   :  { %798 = shalt.err (!%p795_p2)
}
   0x8   :  { %s799_s10 = scalar_lea.vmem %s26_s25, 8192  ;;  %p804_p4 = scmp.lt.s32.totalorder %s26_s25, %s26_s25 }
   0x9   :  { %p800_p3 = scmp.ne.s32.totalorder %s26_s25, %s799_s10  ;;  %p805_p5 = scmp.lt.s32.totalorder %s799_s10, %s799_s10 }
   0xb   :  { %p806_p6 = por %p805_p5, %p804_p4 }
   0xd   :  { %p807_p7 = pnand %p806_p6, %p800_p3 }
   0xf   :  { %810 = shalt.err (!%p807_p7)
}
  0x10   :  { %s838_s11 = smov 256   ;;  %s839_s12 = smov 16  }
  0x11   :  { %31 = dma.hbm_to_vmem [thread:$0]  %s1124_s3, 8192, %s26_s25, [#allocation3], %s838_s11, %s838_s11, %s839_s12  }
  0x12   :  { %833 = dma.done.wait [#allocation3], 8192  }
  0x13   :  { %834 = vsyncadd [#allocation3], 4294959104  ;;  %v840_v0 = vmov 0.0   ;;  %v50_v1 = vld [vmem:[%s1122_s1 + $0x8] sm:$0xff]  ;;  %v52_v2 = vld [vmem:[%s1122_s1 + $0x18] sm:$0xff]  ;;  %vm77_vm0 = vcmask 523264  }
  0x14   :  { %166 = vmatprep.mubr.f32.mxu0 %v840_v0  ;;  %v49_v3 = vld [vmem:[%s1122_s1] sm:$0xff]  ;;  %v670_v4 = vpack.c.bf16 %v52_v2, %v50_v1  ;;  %v51_v5 = vld [vmem:[%s1122_s1 + $0x10] sm:$0xff]  ;;  %v54_v6 = vld [vmem:[%s1122_s1 + $0x28] sm:$0xff] }
  0x15   :  { %v56_v7 = vld [vmem:[%s1122_s1 + $0x38] sm:$0xff]  ;;  %v672_v8 = vpack.c.bf16 %v51_v5, %v49_v3  ;;  %v53_v10 = vld [vmem:[%s1122_s1 + $0x20] sm:$0xff]  ;;  %v55_v11 = vld [vmem:[%s1122_s1 + $0x30] sm:$0xff] }
  0x16   :  { %v674_v9 = vpack.c.bf16 %v56_v7, %v54_v6  ;;  %v58_v12 = vld [vmem:[%s1122_s1 + $0x48] sm:$0xff]  ;;  %671 = vmatprep.subr.bf16.mxu0 %v670_v4  ;;  %v60_v13 = vld [vmem:[%s1122_s1 + $0x58] sm:$0xff]  ;;  %v676_v14 = vpack.c.bf16 %v55_v11, %v53_v10  ;;  %v57_v16 = vld [vmem:[%s1122_s1 + $0x40] sm:$0xff] }
  0x17   :  { %673 = vmatpush1.bf16.msra.mxu0 %v672_v8  ;;  %v678_v15 = vpack.c.bf16 %v60_v13, %v58_v12  ;;  %v59_v17 = vld [vmem:[%s1122_s1 + $0x50] sm:$0xff]  ;;  %v62_v18 = vld [vmem:[%s1122_s1 + $0x68] sm:$0xff]  ;;  %v64_v19 = vld [vmem:[%s1122_s1 + $0x78] sm:$0xff] }
  0x18   :  { %675 = vmatprep.subr.bf16.mxu0 %v674_v9  ;;  %v61_v20 = vld [vmem:[%s1122_s1 + $0x60] sm:$0xff]  ;;  %v63_v21 = vld [vmem:[%s1122_s1 + $0x70] sm:$0xff]  ;;  %v680_v22 = vpack.c.bf16 %v59_v17, %v57_v16  ;;  %v232_v23 = vld [vmem:[#allocation2 + $0x8] sm:$0xff]  ;;  %v682_v26 = vpack.c.bf16 %v64_v19, %v62_v18 }
  0x19   :  { %v234_v24 = vld [vmem:[#allocation2 + $0x18] sm:$0xff]  ;;  %v231_v25 = vld [vmem:[#allocation2] sm:$0xff]  ;;  %v233_v28 = vld [vmem:[#allocation2 + $0x10] sm:$0xff]  ;;  %v684_v37 = vpack.c.bf16 %v63_v21, %v61_v20 }
  0x1a   :  { %v686_v27 = vpack.c.bf16 %v234_v24, %v232_v23  ;;  %v236_v29 = vld [vmem:[#allocation2 + $0x28] sm:$0xff]  ;;  %v238_v30 = vld [vmem:[#allocation2 + $0x38] sm:$0xff]  ;;  %v688_v31 = vpack.c.bf16 %v233_v28, %v231_v25  ;;  %v235_v33 = vld [vmem:[#allocation2 + $0x20] sm:$0xff] }
  0x1b   :  { %677 = vmatpush1.bf16.msra.mxu0 %v676_v14  ;;  %v690_v32 = vpack.c.bf16 %v238_v30, %v236_v29  ;;  %v237_v34 = vld [vmem:[#allocation2 + $0x30] sm:$0xff]  ;;  %v240_v35 = vld [vmem:[#allocation2 + $0x48] sm:$0xff]  ;;  %v242_v36 = vld [vmem:[#allocation2 + $0x58] sm:$0xff] }
  0x1c   :  { %679 = vmatprep.subr.bf16.mxu0 %v678_v15  ;;  %687 = vmatprep.subr.bf16.mxu1 %v686_v27  ;;  %v692_v38 = vpack.c.bf16 %v237_v34, %v235_v33  ;;  %v694_v39 = vpack.c.bf16 %v242_v36, %v240_v35  ;;  %v239_v40 = vld [vmem:[#allocation2 + $0x40] sm:$0xff]  ;;  %v241_v41 = vld [vmem:[#allocation2 + $0x50] sm:$0xff]  ;;  %v244_v42 = vld [vmem:[#allocation2 + $0x68] sm:$0xff] }
  0x1d   :  { %689 = vmatpush1.bf16.msra.mxu1 %v688_v31  ;;  %v246_v43 = vld [vmem:[#allocation2 + $0x78] sm:$0xff]  ;;  %v41_v44 = vld [vmem:[%s1121_s0] sm:$0xff]  ;;  %v696_v45 = vpack.c.bf16 %v241_v41, %v239_v40  ;;  %v245_v48 = vld [vmem:[#allocation2 + $0x70] sm:$0xff] }
  0x1e   :  { %691 = vmatprep.subr.bf16.mxu1 %v690_v32  ;;  %v698_v46 = vpack.c.bf16 %v246_v43, %v244_v42  ;;  %v243_v47 = vld [vmem:[#allocation2 + $0x60] sm:$0xff]  ;;  %v248_v49 = vld [vmem:[#allocation2 + $0x88] sm:$0xff]  ;;  %v250_v50 = vld [vmem:[#allocation2 + $0x98] sm:$0xff] }
  0x1f   :  { %681 = vmatpush1.bf16.msra.mxu0 %v680_v22  ;;  %v42_v51 = vld [vmem:[%s1121_s0 + $0x8] sm:$0xff]  ;;  %v700_v52 = vpack.c.bf16 %v245_v48, %v243_v47  ;;  %v702_v53 = vpack.c.bf16 %v250_v50, %v248_v49  ;;  %v247_v54 = vld [vmem:[#allocation2 + $0x80] sm:$0xff]  ;;  %v249_v55 = vld [vmem:[#allocation2 + $0x90] sm:$0xff] }
  0x20   :  { %683 = vmatprep.subr.bf16.mxu0 %v682_v26  ;;  %v252_v56 = vld [vmem:[#allocation2 + $0xa8] sm:$0xff]  ;;  %v254_v57 = vld [vmem:[#allocation2 + $0xb8] sm:$0xff]  ;;  %v43_v58 = vld [vmem:[%s1121_s0 + $0x10] sm:$0xff]  ;;  %v704_v59 = vpack.c.bf16 %v249_v55, %v247_v54 }
  0x21   :  { %693 = vmatpush1.bf16.msra.mxu1 %v692_v38  ;;  %v706_v60 = vpack.c.bf16 %v254_v57, %v252_v56  ;;  %v251_v61 = vld [vmem:[#allocation2 + $0xa0] sm:$0xff]  ;;  %v253_v62 = vld [vmem:[#allocation2 + $0xb0] sm:$0xff]  ;;  %v256_v63 = vld [vmem:[#allocation2 + $0xc8] sm:$0xff] }
  0x22   :  { %695 = vmatprep.subr.bf16.mxu1 %v694_v39  ;;  %v258_v1 = vld [vmem:[#allocation2 + $0xd8] sm:$0xff]  ;;  %v708_v3 = vpack.c.bf16 %v253_v62, %v251_v61  ;;  %v255_v5 = vld [vmem:[#allocation2 + $0xc0] sm:$0xff]  ;;  %v257_v6 = vld [vmem:[#allocation2 + $0xd0] sm:$0xff] }
  0x23   :  { %685 = vmatpush1.bf16.msra.mxu0 %v684_v37  ;;  %v44_v2 = vld [vmem:[%s1121_s0 + $0x18] sm:$0xff]  ;;  %v710_v4 = vpack.c.bf16 %v258_v1, %v256_v63  ;;  %v260_v7 = vld [vmem:[#allocation2 + $0xe8] sm:$0xff]  ;;  %v45_v9 = vld [vmem:[%s1121_s0 + $0x20] sm:$0xff]  ;;  %v712_v10 = vpack.c.bf16 %v257_v6, %v255_v5 }
  0x24   :  { %v262_v8 = vld [vmem:[#allocation2 + $0xf8] sm:$0xff]  ;;  %v259_v12 = vld [vmem:[#allocation2 + $0xe0] sm:$0xff]  ;;  %v261_v13 = vld [vmem:[#allocation2 + $0xf0] sm:$0xff] }
  0x25   :  { %697 = vmatpush1.bf16.msra.mxu1 %v696_v45  ;;  %v714_v11 = vpack.c.bf16 %v262_v8, %v260_v7  ;;  %v264_v14 = vld [vmem:[#allocation2 + $0x108] sm:$0xff]  ;;  %v266_v15 = vld [vmem:[#allocation2 + $0x118] sm:$0xff]  ;;  %v716_v17 = vpack.c.bf16 %v261_v13, %v259_v12  ;;  %v263_v19 = vld [vmem:[#allocation2 + $0x100] sm:$0xff] }
  0x26   :  { %605 = vmatmul.mubr.msk.f32.vlgmr.msra.gmra.mrb[0].mxu0 %vm77_vm0, %v41_v44  ;;  %699 = vmatprep.subr.bf16.mxu1 %v698_v46  ;;  %v46_v16 = vld [vmem:[%s1121_s0 + $0x28] sm:$0xff]  ;;  %v718_v18 = vpack.c.bf16 %v266_v15, %v264_v14  ;;  %v265_v20 = vld [vmem:[#allocation2 + $0x110] sm:$0xff]  ;;  %v270_v22 = vld [vmem:[#allocation2 + $0x138] sm:$0xff] }
  0x27   :  { %172 = vmatprep.mubr.f32.mxu0 %v840_v0  ;;  %v268_v21 = vld [vmem:[#allocation2 + $0x128] sm:$0xff]  ;;  %v47_v23 = vld [vmem:[%s1121_s0 + $0x30] sm:$0xff]  ;;  %v720_v24 = vpack.c.bf16 %v265_v20, %v263_v19  ;;  %v267_v26 = vld [vmem:[#allocation2 + $0x120] sm:$0xff] }
  0x28   :  { %v722_v25 = vpack.c.bf16 %v270_v22, %v268_v21  ;;  %v269_v27 = vld [vmem:[#allocation2 + $0x130] sm:$0xff]  ;;  %v272_v28 = vld [vmem:[#allocation2 + $0x148] sm:$0xff]  ;;  %v274_v29 = vld [vmem:[#allocation2 + $0x158] sm:$0xff] }
  0x29   :  { %701 = vmatpush1.bf16.msra.mxu1 %v700_v52  ;;  %v48_v30 = vld [vmem:[%s1121_s0 + $0x38] sm:$0xff]  ;;  %v724_v31 = vpack.c.bf16 %v269_v27, %v267_v26  ;;  %v726_v32 = vpack.c.bf16 %v274_v29, %v272_v28  ;;  %v271_v33 = vld [vmem:[#allocation2 + $0x140] sm:$0xff]  ;;  %v273_v34 = vld [vmem:[#allocation2 + $0x150] sm:$0xff] }
  0x2a   :  { %606 = vmatmul.mubr.msk.f32.gmra.mrb[2].mxu0 %vm77_vm0, %v42_v51  ;;  %703 = vmatprep.subr.bf16.mxu1 %v702_v53  ;;  %v276_v35 = vld [vmem:[#allocation2 + $0x168] sm:$0xff]  ;;  %v278_v36 = vld [vmem:[#allocation2 + $0x178] sm:$0xff]  ;;  %v728_v37 = vpack.c.bf16 %v273_v34, %v271_v33  ;;  %v275_v39 = vld [vmem:[#allocation2 + $0x160] sm:$0xff] }
  0x2b   :  { %178 = vmatprep.mubr.f32.mxu0 %v840_v0  ;;  %v730_v38 = vpack.c.bf16 %v278_v36, %v276_v35  ;;  %v280_v40 = vld [vmem:[#allocation2 + $0x188] sm:$0xff]  ;;  %v282_v41 = vld [vmem:[#allocation2 + $0x198] sm:$0xff]  ;;  %v279_v44 = vld [vmem:[#allocation2 + $0x180] sm:$0xff] }
  0x2c   :  { %v734_v43 = vpack.c.bf16 %v282_v41, %v280_v40  ;;  %v281_v45 = vld [vmem:[#allocation2 + $0x190] sm:$0xff]  ;;  %v284_v46 = vld [vmem:[#allocation2 + $0x1a8] sm:$0xff]  ;;  %v286_v47 = vld [vmem:[#allocation2 + $0x1b8] sm:$0xff] }
  0x2d   :  { %705 = vmatpush1.bf16.msra.mxu1 %v704_v59  ;;  %v736_v48 = vpack.c.bf16 %v281_v45, %v279_v44  ;;  %v738_v49 = vpack.c.bf16 %v286_v47, %v284_v46  ;;  %v283_v50 = vld [vmem:[#allocation2 + $0x1a0] sm:$0xff]  ;;  %v285_v51 = vld [vmem:[#allocation2 + $0x1b0] sm:$0xff]  ;;  %v288_v52 = vld [vmem:[#allocation2 + $0x1c8] sm:$0xff] }
  0x2e   :  { %607 = vmatmul.mubr.msk.f32.gmra.mrb[4].mxu0 %vm77_vm0, %v43_v58  ;;  %707 = vmatprep.subr.bf16.mxu1 %v706_v60  ;;  %v290_v53 = vld [vmem:[#allocation2 + $0x1d8] sm:$0xff]  ;;  %v740_v54 = vpack.c.bf16 %v285_v51, %v283_v50  ;;  %v287_v56 = vld [vmem:[#allocation2 + $0x1c0] sm:$0xff]  ;;  %v289_v57 = vld [vmem:[#allocation2 + $0x1d0] sm:$0xff] }
  0x2f   :  { %184 = vmatprep.mubr.f32.mxu0 %v840_v0  ;;  %v742_v55 = vpack.c.bf16 %v290_v53, %v288_v52  ;;  %v744_v58 = vpack.c.bf16 %v289_v57, %v287_v56  ;;  %v292_v59 = vld [vmem:[#allocation2 + $0x1e8] sm:$0xff]  ;;  %v294_v60 = vld [vmem:[#allocation2 + $0x1f8] sm:$0xff]  ;;  %v291_v62 = vld [vmem:[#allocation2 + $0x1e0] sm:$0xff] }
  0x30   :  { %v746_v61 = vpack.c.bf16 %v294_v60, %v292_v59  ;;  %v293_v63 = vld [vmem:[#allocation2 + $0x1f0] sm:$0xff]  ;;  %v437_v6 = vld [vmem:[%s1126_s5 + $0x8] sm:$0xff]  ;;  %v455_v8 = vld [vmem:[%s1126_s5 + $0x98] sm:$0xff] }
  0x31   :  { %709 = vmatpush1.bf16.msra.mxu1 %v708_v3  ;;  %v748_v1 = vpack.c.bf16 %v293_v63, %v291_v62  ;;  %v453_v3 = vld [vmem:[%s1126_s5 + $0x88] sm:$0xff]  ;;  %v454_v7 = vld [vmem:[%s1126_s5 + $0x90] sm:$0xff]  ;;  %v439_v12 = vld [vmem:[%s1126_s5 + $0x18] sm:$0xff] }
  0x32   :  { %608 = vmatmul.mubr.msk.f32.gmra.mrb[6].mxu0 %vm77_vm0, %v44_v2  ;;  %711 = vmatprep.subr.bf16.mxu1 %v710_v4  ;;  %v452_v2 = vld [vmem:[%s1126_s5 + $0x80] sm:$0xff]  ;;  %v457_v14 = vld [vmem:[%s1126_s5 + $0xa8] sm:$0xff]  ;;  %v458_v19 = vld [vmem:[%s1126_s5 + $0xb0] sm:$0xff] }
  0x33   :  { %190 = vmatprep.mubr.f32.mxu0 %v840_v0  ;;  %v436_v4 = vld [vmem:[%s1126_s5] sm:$0xff]  ;;  %v750_v5 = vpack.c.bf16 %v453_v3, %v452_v2  ;;  %v459_v20 = vld [vmem:[%s1126_s5 + $0xb8] sm:$0xff]  ;;  %v461_v26 = vld [vmem:[%s1126_s5 + $0xc8] sm:$0xff] }
  0x34   :  { %v456_v13 = vld [vmem:[%s1126_s5 + $0xa0] sm:$0xff]  ;;  %v762_v22 = vpack.c.bf16 %v459_v20, %v458_v19  ;;  %v446_v35 = vld [vmem:[%s1126_s5 + $0x50] sm:$0xff]  ;;  %v447_v36 = vld [vmem:[%s1126_s5 + $0x58] sm:$0xff] }
  0x35   :  { %713 = vmatpush1.bf16.msra.mxu1 %v712_v10  ;;  %v754_v10 = vpack.c.bf16 %v455_v8, %v454_v7  ;;  %751 = vmatprep.subr.bf16.mxu0 %v750_v5  ;;  %v444_v29 = vld [vmem:[%s1126_s5 + $0x40] sm:$0xff]  ;;  %v449_v41 = vld [vmem:[%s1126_s5 + $0x68] sm:$0xff] }
  0x36   :  { %609 = vmatmul.mubr.msk.f32.gmra.mrb[8].mxu0 %vm77_vm0, %v45_v9  ;;  %715 = vmatprep.subr.bf16.mxu1 %v714_v11  ;;  %v752_v9 = vpack.c.bf16 %v437_v6, %v436_v4  ;;  %v438_v11 = vld [vmem:[%s1126_s5 + $0x10] sm:$0xff]  ;;  %v448_v40 = vld [vmem:[%s1126_s5 + $0x60] sm:$0xff] }
  0x37   :  { %196 = vmatprep.mubr.f32.mxu0 %v840_v0  ;;  %v756_v15 = vpack.c.bf16 %v439_v12, %v438_v11  ;;  %v65_v46 = vld [vmem:[%s1123_s2] sm:$0x3] }
  0x38   :  { %753 = vmatpush3.bf16.msra.mxu0 %v752_v9 }
  0x39   :  { %717 = vmatpush1.bf16.msra.mxu1 %v716_v17  ;;  %755 = vmatprep.subr.bf16.mxu0 %v754_v10  ;;  %v440_v17 = vld [vmem:[%s1126_s5 + $0x20] sm:$0xff] }
  0x3a   :  { %610 = vmatmul.mubr.msk.f32.gmra.mrb[10].mxu0 %vm77_vm0, %v46_v16  ;;  %719 = vmatprep.subr.bf16.mxu1 %v718_v18  ;;  %v758_v16 = vpack.c.bf16 %v457_v14, %v456_v13  ;;  %v441_v18 = vld [vmem:[%s1126_s5 + $0x28] sm:$0xff] }
  0x3b   :  { %202 = vmatprep.mubr.f32.mxu0 %v840_v0  ;;  %v760_v21 = vpack.c.bf16 %v441_v18, %v440_v17 }
  0x3c   :  { %757 = vmatpush3.bf16.msra.mxu0 %v756_v15 }
  0x3d   :  { %721 = vmatpush1.bf16.msra.mxu1 %v720_v24  ;;  %759 = vmatprep.subr.bf16.mxu0 %v758_v16  ;;  %v443_v24 = vld [vmem:[%s1126_s5 + $0x38] sm:$0xff] }
  0x3e   :  { %611 = vmatmul.mubr.msk.f32.gmra.mrb[12].mxu0 %vm77_vm0, %v47_v23  ;;  %723 = vmatprep.subr.bf16.mxu1 %v722_v25  ;;  %v442_v23 = vld [vmem:[%s1126_s5 + $0x30] sm:$0xff]  ;;  %v460_v25 = vld [vmem:[%s1126_s5 + $0xc0] sm:$0xff] }
  0x3f   :  { %208 = vmatprep.mubr.f32.mxu0 %v840_v0  ;;  %v277_v0 = vld [vmem:[#allocation2 + $0x170] sm:$0xff]  ;;  %v764_v27 = vpack.c.bf16 %v443_v24, %v442_v23  ;;  %v766_v28 = vpack.c.bf16 %v461_v26, %v460_v25 }
  0x40   :  { %v732_v42 = vpack.c.bf16 %v277_v0, %v275_v39  ;;  %761 = vmatpush3.bf16.msra.mxu0 %v760_v21  ;;  %v772_v39 = vpack.c.bf16 %v447_v36, %v446_v35  ;;  %v466_v35 = vld [vmem:[%s1126_s5 + $0xf0] sm:$0xff]  ;;  %v467_v36 = vld [vmem:[%s1126_s5 + $0xf8] sm:$0xff] }
  0x41   :  { %725 = vmatpush1.bf16.msra.mxu1 %v724_v31  ;;  %763 = vmatprep.subr.bf16.mxu0 %v762_v22  ;;  %v462_v31 = vld [vmem:[%s1126_s5 + $0xd0] sm:$0xff] }
  0x42   :  { %612 = vmatmul.mubr.msk.f32.gmra.mrb[14].mxu0 %vm77_vm0, %v48_v30  ;;  %727 = vmatprep.subr.bf16.mxu1 %v726_v32  ;;  %v445_v30 = vld [vmem:[%s1126_s5 + $0x48] sm:$0xff]  ;;  %v463_v32 = vld [vmem:[%s1126_s5 + $0xd8] sm:$0xff] }
  0x43   :  { %v768_v33 = vpack.c.bf16 %v445_v30, %v444_v29  ;;  %v770_v34 = vpack.c.bf16 %v463_v32, %v462_v31 }
  0x44   :  { %765 = vmatpush3.bf16.msra.mxu0 %v764_v27 }
  0x45   :  { %729 = vmatpush1.bf16.msra.mxu1 %v728_v37  ;;  %767 = vmatprep.subr.bf16.mxu0 %v766_v28  ;;  %v464_v37 = vld [vmem:[%s1126_s5 + $0xe0] sm:$0xff] }
  0x46   :  { %731 = vmatprep.subr.bf16.mxu1 %v730_v38  ;;  %v465_v38 = vld [vmem:[%s1126_s5 + $0xe8] sm:$0xff] }
  0x47   :  { %v774_v0 = vpack.c.bf16 %v465_v38, %v464_v37  ;;  %v778_v37 = vpack.c.bf16 %v467_v36, %v466_v35  ;;  %v450_v38 = vld [vmem:[%s1126_s5 + $0x70] sm:$0xff] }
  0x48   :  { %769 = vmatpush3.bf16.msra.mxu0 %v768_v33 }
  0x49   :  { %733 = vmatpush1.bf16.msra.mxu1 %v732_v42  ;;  %771 = vmatprep.subr.bf16.mxu0 %v770_v34  ;;  %v776_v42 = vpack.c.bf16 %v449_v41, %v448_v40  ;;  %v295_v40 = vld [vmem:[%s1125_s4] sm:$0x3] }
  0x4a   :  { %735 = vmatprep.subr.bf16.mxu1 %v734_v43  ;;  %v67_v43 = vlaneseq }
  0x4c   :  { %773 = vmatpush3.bf16.msra.mxu0 %v772_v39  ;;  %v1068_v44 = vshrl.u32 %v67_v43, 7  ;;  %v451_v39 = vld [vmem:[%s1126_s5 + $0x78] sm:$0xff] }
  0x4d   :  { %737 = vmatpush1.bf16.msra.mxu1 %v736_v48  ;;  %775 = vmatprep.subr.bf16.mxu0 %v774_v0  ;;  %v780_v0 = vpack.c.bf16 %v451_v39, %v450_v38 }
  0x4e   :  { %739 = vmatprep.subr.bf16.mxu1 %v738_v49  ;;  %v69_v45 = vsub.s32 0, %v1068_v44  ;;  %v73_v47 = vsub.s32 1, %v1068_v44 }
  0x50   :  { %777 = vmatpush3.bf16.msra.mxu0 %v776_v42  ;;  %v70_v48 = vrot.slane %v65_v46, %v69_v45  ;;  %v74_v49 = vrot.slane %v65_v46, %v73_v47  ;;  %v300_v41 = vrot.slane %v295_v40, %v69_v45  ;;  %v304_v42 = vrot.slane %v295_v40, %v73_v47 }
  0x51   :  { %741 = vmatpush1.bf16.msra.mxu1 %v740_v54  ;;  %779 = vmatprep.subr.bf16.mxu0 %v778_v37 }
  0x52   :  { %743 = vmatprep.subr.bf16.mxu1 %v742_v55 }
  0x54   :  { %781 = vmatpush3.bf16.msra.mxu0 %v780_v0 }
  0x55   :  { %745 = vmatpush1.bf16.msra.mxu1 %v744_v58 }
  0x56   :  { %747 = vmatprep.subr.bf16.mxu1 %v746_v61 }
  0x59   :  { %749 = vmatpush1.bf16.msra.mxu1 %v748_v1 }
  0xf9   :  { %v168_v50 = vpop.f32.mrb[0].mxu0 }
  0xfa   :  { %v169_v51 = vadd.f32 %v168_v50, %v70_v48  ;;  %v170_v52 = vpop.f32.mrb[1].mxu0 }
  0xfb   :  { %v171_v53 = vadd.f32 %v170_v52, %v74_v49 }
  0xfc   :  { %v215_v56 = vmax.f32 %v169_v51, 0.0 }
  0xfd   :  { %v174_v54 = vpop.f32.mrb[2].mxu0  ;;  %v216_v55 = vmax.f32 %v171_v53, 0.0 }
  0xfe   :  { %v175_v57 = vadd.f32 %v174_v54, %v70_v48  ;;  %v176_v58 = vpop.f32.mrb[3].mxu0 }
  0xff   :  { %v177_v59 = vadd.f32 %v176_v58, %v74_v49  ;;  %371 = vmatprep.mubr.f32.mxu1 %v216_v55 }
 0x100   :  { %372 = vmatmul.mubr.f32.vlgmr.msra.gmra.mrb[0].mxu1 %v215_v56  ;;  %v217_v62 = vmax.f32 %v175_v57, 0.0 }
 0x101   :  { %v218_v60 = vmax.f32 %v177_v59, 0.0  ;;  %v180_v61 = vpop.f32.mrb[4].mxu0 }
 0x102   :  { %v181_v63 = vadd.f32 %v180_v61, %v70_v48  ;;  %v182_v1 = vpop.f32.mrb[5].mxu0 }
 0x103   :  { %v183_v2 = vadd.f32 %v182_v1, %v74_v49  ;;  %377 = vmatprep.mubr.f32.mxu1 %v218_v60 }
 0x104   :  { %378 = vmatmul.mubr.f32.gmra.mrb[2].mxu1 %v217_v62  ;;  %v219_v5 = vmax.f32 %v181_v63, 0.0 }
 0x105   :  { %v220_v3 = vmax.f32 %v183_v2, 0.0  ;;  %v186_v4 = vpop.f32.mrb[6].mxu0 }
 0x106   :  { %v187_v6 = vadd.f32 %v186_v4, %v70_v48  ;;  %v188_v7 = vpop.f32.mrb[7].mxu0 }
 0x107   :  { %v189_v8 = vadd.f32 %v188_v7, %v74_v49  ;;  %383 = vmatprep.mubr.f32.mxu1 %v220_v3 }
 0x108   :  { %384 = vmatmul.mubr.f32.gmra.mrb[4].mxu1 %v219_v5  ;;  %v221_v11 = vmax.f32 %v187_v6, 0.0 }
 0x109   :  { %v222_v9 = vmax.f32 %v189_v8, 0.0  ;;  %v192_v10 = vpop.f32.mrb[8].mxu0 }
 0x10a   :  { %v193_v12 = vadd.f32 %v192_v10, %v70_v48  ;;  %v194_v13 = vpop.f32.mrb[9].mxu0 }
 0x10b   :  { %v195_v14 = vadd.f32 %v194_v13, %v74_v49  ;;  %389 = vmatprep.mubr.f32.mxu1 %v222_v9 }
 0x10c   :  { %390 = vmatmul.mubr.f32.gmra.mrb[6].mxu1 %v221_v11  ;;  %v223_v17 = vmax.f32 %v193_v12, 0.0 }
 0x10d   :  { %v224_v15 = vmax.f32 %v195_v14, 0.0  ;;  %v198_v16 = vpop.f32.mrb[10].mxu0 }
 0x10e   :  { %v199_v18 = vadd.f32 %v198_v16, %v70_v48  ;;  %v200_v19 = vpop.f32.mrb[11].mxu0 }
 0x10f   :  { %v201_v20 = vadd.f32 %v200_v19, %v74_v49  ;;  %395 = vmatprep.mubr.f32.mxu1 %v224_v15 }
 0x110   :  { %396 = vmatmul.mubr.f32.gmra.mrb[8].mxu1 %v223_v17  ;;  %v225_v23 = vmax.f32 %v199_v18, 0.0 }
 0x111   :  { %v226_v21 = vmax.f32 %v201_v20, 0.0  ;;  %v204_v22 = vpop.f32.mrb[12].mxu0 }
 0x112   :  { %v205_v24 = vadd.f32 %v204_v22, %v70_v48  ;;  %v206_v25 = vpop.f32.mrb[13].mxu0 }
 0x113   :  { %v207_v26 = vadd.f32 %v206_v25, %v74_v49  ;;  %401 = vmatprep.mubr.f32.mxu1 %v226_v21 }
 0x114   :  { %402 = vmatmul.mubr.f32.gmra.mrb[10].mxu1 %v225_v23  ;;  %v227_v29 = vmax.f32 %v205_v24, 0.0 }
 0x115   :  { %v228_v27 = vmax.f32 %v207_v26, 0.0  ;;  %v210_v28 = vpop.f32.mrb[14].mxu0 }
 0x116   :  { %v211_v30 = vadd.f32 %v210_v28, %v70_v48  ;;  %v212_v31 = vpop.f32.mrb[15].mxu0 }
 0x117   :  { %v213_v32 = vadd.f32 %v212_v31, %v74_v49  ;;  %407 = vmatprep.mubr.f32.mxu1 %v228_v27 }
 0x118   :  { %408 = vmatmul.mubr.f32.gmra.mrb[12].mxu1 %v227_v29  ;;  %v229_v34 = vmax.f32 %v211_v30, 0.0  ;;  %v613_v29 = vld [vmem:[%s1127_s6] ss:$0 sm:$0xff]  ;;  %s841_s6 = smov [#allocation5]  }
 0x119   :  { %v230_v33 = vmax.f32 %v213_v32, 0.0  ;;  %s593_s26 = sshll.u32 %s841_s6, 4  ;;  %s594_s26 = int_to_ptr.vmem [resolvable:$true] %s593_s26 }
 0x11a   :  { %s811_s27 = scalar_lea.vmem %s594_s26, 1024  ;;  %p816_p9 = scmp.lt.s32.totalorder %s594_s26, %s594_s26 }
 0x11b   :  { %413 = vmatprep.mubr.f32.mxu1 %v230_v33  ;;  %p812_p8 = scmp.ne.s32.totalorder %s594_s26, %s811_s27  ;;  %p817_p10 = scmp.lt.s32.totalorder %s811_s27, %s811_s27 }
 0x11c   :  { %414 = vmatmul.mubr.f32.gmra.mrb[14].mxu1 %v229_v34 }
 0x11d   :  { %p818_p11 = por %p817_p10, %p816_p9 }
 0x11f   :  { %p819_p12 = pnand %p818_p11, %p812_p8 }
 0x1d3   :  { %v373_v43 = vpop.f32.mrb[0].mxu1 }
 0x1d4   :  { %v374_v46 = vadd.f32 %v373_v43, %v300_v41  ;;  %v375_v48 = vpop.f32.mrb[1].mxu1 }
 0x1d5   :  { %v376_v49 = vadd.f32 %v375_v48, %v304_v42 }
 0x1d6   :  { %v420_v52 = vmax.f32 %v374_v46, 0.0 }
 0x1d7   :  { %v421_v50 = vmax.f32 %v376_v49, 0.0  ;;  %v379_v51 = vpop.f32.mrb[2].mxu1 }
 0x1d8   :  { %v380_v53 = vadd.f32 %v379_v51, %v300_v41  ;;  %v381_v54 = vpop.f32.mrb[3].mxu1 }
 0x1d9   :  { %v382_v55 = vadd.f32 %v381_v54, %v304_v42  ;;  %539 = vmatprep.mubr.f32.mxu0 %v421_v50 }
 0x1da   :  { %540 = vmatmul.mubr.f32.vlgmr.msra.gmra.mrb[16].mxu0 %v420_v52  ;;  %v422_v58 = vmax.f32 %v380_v53, 0.0 }
 0x1db   :  { %v423_v56 = vmax.f32 %v382_v55, 0.0  ;;  %v385_v57 = vpop.f32.mrb[4].mxu1 }
 0x1dc   :  { %v386_v59 = vadd.f32 %v385_v57, %v300_v41  ;;  %v387_v45 = vpop.f32.mrb[5].mxu1 }
 0x1dd   :  { %v388_v60 = vadd.f32 %v387_v45, %v304_v42  ;;  %544 = vmatprep.mubr.f32.mxu0 %v423_v56 }
 0x1de   :  { %545 = vmatmul.mubr.f32.gmra.mrb[18].mxu0 %v422_v58  ;;  %v424_v61 = vmax.f32 %v386_v59, 0.0 }
 0x1df   :  { %v425_v44 = vmax.f32 %v388_v60, 0.0  ;;  %v391_v47 = vpop.f32.mrb[6].mxu1 }
 0x1e0   :  { %v392_v62 = vadd.f32 %v391_v47, %v300_v41  ;;  %v393_v63 = vpop.f32.mrb[7].mxu1 }
 0x1e1   :  { %v394_v1 = vadd.f32 %v393_v63, %v304_v42  ;;  %549 = vmatprep.mubr.f32.mxu0 %v425_v44 }
 0x1e2   :  { %550 = vmatmul.mubr.f32.gmra.mrb[20].mxu0 %v424_v61  ;;  %v426_v4 = vmax.f32 %v392_v62, 0.0 }
 0x1e3   :  { %v427_v2 = vmax.f32 %v394_v1, 0.0  ;;  %v397_v3 = vpop.f32.mrb[8].mxu1 }
 0x1e4   :  { %v398_v5 = vadd.f32 %v397_v3, %v300_v41  ;;  %v399_v6 = vpop.f32.mrb[9].mxu1 }
 0x1e5   :  { %v400_v7 = vadd.f32 %v399_v6, %v304_v42  ;;  %554 = vmatprep.mubr.f32.mxu0 %v427_v2 }
 0x1e6   :  { %555 = vmatmul.mubr.f32.gmra.mrb[22].mxu0 %v426_v4  ;;  %v428_v10 = vmax.f32 %v398_v5, 0.0 }
 0x1e7   :  { %v429_v8 = vmax.f32 %v400_v7, 0.0  ;;  %v403_v9 = vpop.f32.mrb[10].mxu1 }
 0x1e8   :  { %v404_v11 = vadd.f32 %v403_v9, %v300_v41  ;;  %v405_v12 = vpop.f32.mrb[11].mxu1 }
 0x1e9   :  { %v406_v13 = vadd.f32 %v405_v12, %v304_v42  ;;  %559 = vmatprep.mubr.f32.mxu0 %v429_v8 }
 0x1ea   :  { %560 = vmatmul.mubr.f32.gmra.mrb[24].mxu0 %v428_v10  ;;  %v430_v16 = vmax.f32 %v404_v11, 0.0 }
 0x1eb   :  { %v431_v14 = vmax.f32 %v406_v13, 0.0  ;;  %v409_v15 = vpop.f32.mrb[12].mxu1 }
 0x1ec   :  { %v410_v17 = vadd.f32 %v409_v15, %v300_v41  ;;  %v411_v18 = vpop.f32.mrb[13].mxu1 }
 0x1ed   :  { %v412_v19 = vadd.f32 %v411_v18, %v304_v42  ;;  %564 = vmatprep.mubr.f32.mxu0 %v431_v14 }
 0x1ee   :  { %565 = vmatmul.mubr.f32.gmra.mrb[26].mxu0 %v430_v16  ;;  %v432_v22 = vmax.f32 %v410_v17, 0.0 }
 0x1ef   :  { %v433_v20 = vmax.f32 %v412_v19, 0.0  ;;  %v415_v21 = vpop.f32.mrb[14].mxu1 }
 0x1f0   :  { %v416_v23 = vadd.f32 %v415_v21, %v300_v41  ;;  %v417_v24 = vpop.f32.mrb[15].mxu1 }
 0x1f1   :  { %v418_v25 = vadd.f32 %v417_v24, %v304_v42  ;;  %569 = vmatprep.mubr.f32.mxu0 %v433_v20 }
 0x1f2   :  { %570 = vmatmul.mubr.f32.gmra.mrb[28].mxu0 %v432_v22  ;;  %v434_v27 = vmax.f32 %v416_v23, 0.0 }
 0x1f3   :  { %v435_v26 = vmax.f32 %v418_v25, 0.0 }
 0x1f5   :  { %574 = vmatprep.mubr.f32.mxu0 %v435_v26 }
 0x1f6   :  { %575 = vmatmul.mubr.f32.gmra.mrb[30].mxu0 %v434_v27 }
 0x2ad   :  { %v646_v28 = vpop.f32.mrb[16].mxu0 }
 0x2ae   :  { %v647_v30 = vpop.f32.mrb[17].mxu0 }
 0x2af   :  { %v648_v31 = vadd.f32 %v647_v30, %v646_v28 }
 0x2b1   :  { %v542_v32 = vadd.f32 %v648_v31, %v613_v29  ;;  %v649_v33 = vpop.f32.mrb[18].mxu0 }
 0x2b2   :  { %v650_v34 = vpop.f32.mrb[19].mxu0 }
 0x2b3   :  { %580 = vst.msk [vmem:[#allocation5] sm:$0xff] %vm77_vm0, %v542_v32  ;;  %v651_v35 = vadd.f32 %v650_v34, %v649_v33 }
 0x2b5   :  { %v547_v36 = vadd.f32 %v651_v35, %v613_v29  ;;  %v652_v37 = vpop.f32.mrb[20].mxu0 }
 0x2b6   :  { %v653_v38 = vpop.f32.mrb[21].mxu0 }
 0x2b7   :  { %581 = vst.msk [vmem:[#allocation5 + $0x8] sm:$0xff] %vm77_vm0, %v547_v36  ;;  %v654_v39 = vadd.f32 %v653_v38, %v652_v37 }
 0x2b9   :  { %v552_v0 = vadd.f32 %v654_v39, %v613_v29  ;;  %v655_v40 = vpop.f32.mrb[22].mxu0 }
 0x2ba   :  { %v656_v41 = vpop.f32.mrb[23].mxu0 }
 0x2bb   :  { %582 = vst.msk [vmem:[#allocation5 + $0x10] sm:$0xff] %vm77_vm0, %v552_v0  ;;  %v657_v42 = vadd.f32 %v656_v41, %v655_v40 }
 0x2bd   :  { %v557_v43 = vadd.f32 %v657_v42, %v613_v29  ;;  %v658_v46 = vpop.f32.mrb[24].mxu0 }
 0x2be   :  { %v659_v48 = vpop.f32.mrb[25].mxu0 }
 0x2bf   :  { %583 = vst.msk [vmem:[#allocation5 + $0x18] sm:$0xff] %vm77_vm0, %v557_v43  ;;  %v660_v49 = vadd.f32 %v659_v48, %v658_v46 }
 0x2c1   :  { %v562_v50 = vadd.f32 %v660_v49, %v613_v29  ;;  %v661_v51 = vpop.f32.mrb[26].mxu0 }
 0x2c2   :  { %v662_v52 = vpop.f32.mrb[27].mxu0 }
 0x2c3   :  { %584 = vst.msk [vmem:[#allocation5 + $0x20] sm:$0xff] %vm77_vm0, %v562_v50  ;;  %v663_v53 = vadd.f32 %v662_v52, %v661_v51 }
 0x2c5   :  { %v567_v54 = vadd.f32 %v663_v53, %v613_v29  ;;  %v664_v55 = vpop.f32.mrb[28].mxu0 }
 0x2c6   :  { %v665_v56 = vpop.f32.mrb[29].mxu0 }
 0x2c7   :  { %585 = vst.msk [vmem:[#allocation5 + $0x28] sm:$0xff] %vm77_vm0, %v567_v54  ;;  %v666_v57 = vadd.f32 %v665_v56, %v664_v55 }
 0x2c9   :  { %v572_v58 = vadd.f32 %v666_v57, %v613_v29  ;;  %v667_v59 = vpop.f32.mrb[30].mxu0 }
 0x2ca   :  { %v668_v45 = vpop.f32.mrb[31].mxu0 }
 0x2cb   :  { %586 = vst.msk [vmem:[#allocation5 + $0x30] sm:$0xff] %vm77_vm0, %v572_v58  ;;  %v669_v60 = vadd.f32 %v668_v45, %v667_v59 }
 0x2cd   :  { %v577_v44 = vadd.f32 %v669_v60, %v613_v29 }
 0x2cf   :  { %587 = vst.msk [vmem:[#allocation5 + $0x38] sm:$0xff] %vm77_vm0, %v577_v44 }
 0x2d0   :  { %822 = shalt.err (!%p819_p12)
}
 0x2d1   :  { %s823_s30 = scalar_lea.hbm %s1128_s7, 1024 }
 0x2d2   :  { %p824_p13 = scmp.ne.s32.totalorder %s1128_s7, %s823_s30  ;;  %p827_p0 = scmp.lt.u32.totalorder %s823_s30, %s1128_s7 }
 0x2d4   :  { %p829_p1 = pnand %p827_p0, %p824_p13 }
 0x2d6   :  { %832 = shalt.err (!%p829_p1)
}
 0x2d7   :  { %s842_s12 = smov 128   ;;  %s843_s13 = smov 8  }
 0x2d8   :  { %599 = dma.vmem_to_hbm [thread:$0]  %s594_s26, 1024, %s1128_s7, [#allocation4], %s842_s12, %s842_s12, %s843_s13  }
 0x2d9   :  { %835 = dma.done.wait [#allocation4], 1024  }
 0x2da   :  { %836 = vsyncadd [#allocation4], 4294966272 }
 0x2db   :  { %603 = vsyncpa [#allocation3], 1 }
 0x2dc   :  { %604 = vsyncpa [#allocation4], 1 }

</bundles_post_ra>
